<compile_context>
chip_gen: v6e
topology: v6e:2x2x1
jax: 0.10.0
libtpu: 0.0.40
codegen_flags: <defaults>
</compile_context>

<pallas_src>
import jax
import jax.numpy as jnp
from jax.experimental import pallas as pl
from jax.experimental.pallas import tpu as pltpu

LANES = 128       # vreg lane width; all packed operands are 128-lane dense
SUB = 16          # bf16 sublane packing: row alignment for slab regions and batch tiles
MAX_TILE = 2048   # batch-tile cap (double-buffered working set ~1.2 MiB at bt=2048)


def _round_up(x, m):
    return (x + m - 1) // m * m


# ----------------------------------------------------------------------------
# parameter packing: one [rows, 128] bf16 slab holding both MLPs
# ----------------------------------------------------------------------------
def pack_params(params):
    ob_dim, hidden = params["w1a"].shape
    n_actions = params["w2a"].shape[1]
    assert 2 * hidden <= LANES, "packed hidden (2H) must fit in one 128-lane tile"
    assert n_actions + 1 <= LANES, "logits + value must fit in one 128-lane tile"

    # All region starts 16-row aligned so bf16 sublane-packed slices never straddle
    # a (16,128) tile boundary.
    r_w1 = 0                               # rows r_w1 .. r_w1+OB-1 : fused layer-1 weights
    r_b1 = _round_up(ob_dim, SUB)          # 1 bias row
    r_w2 = r_b1 + SUB                      # 128 rows: fused (block-diag) layer-2 weights
    r_b2 = r_w2 + LANES                    # 1 bias row
    rows = r_b2 + SUB

    bf = jnp.bfloat16
    slab = jnp.zeros((rows, LANES), bf)
    # layer 1: [OB, 2H] = [w1a | w1c]; lanes >= 2H stay zero (tanh(0)=0, harmless)
    slab = slab.at[r_w1:r_w1 + ob_dim, 0:hidden].set(params["w1a"].astype(bf))
    slab = slab.at[r_w1:r_w1 + ob_dim, hidden:2 * hidden].set(params["w1c"].astype(bf))
    slab = slab.at[r_b1, 0:hidden].set(params["b1a"][0].astype(bf))
    slab = slab.at[r_b1, hidden:2 * hidden].set(params["b1c"][0].astype(bf))
    # layer 2: block diagonal, zero cross-blocks keep actor/critic independent
    slab = slab.at[r_w2:r_w2 + hidden, 0:n_actions].set(params["w2a"].astype(bf))
    slab = slab.at[r_w2 + hidden:r_w2 + 2 * hidden,
                   n_actions:n_actions + 1].set(params["w2c"].astype(bf))
    slab = slab.at[r_b2, 0:n_actions].set(params["b2a"][0].astype(bf))
    slab = slab.at[r_b2, n_actions].set(params["b2c"][0, 0].astype(bf))

    meta = dict(ob_dim=ob_dim, hidden=hidden, n_actions=n_actions,
                r_w1=r_w1, r_b1=r_b1, r_w2=r_w2, r_b2=r_b2, rows=rows)
    return slab, meta


# ----------------------------------------------------------------------------
# batch tiling: big tiles (amortize ~0.35us/step), >=2 even steps for v7x megacore,
# padding bounded by ~SUB rows per step (no full-tile padding waste)
# ----------------------------------------------------------------------------
def _batch_tiling(B):
    b_align = _round_up(max(B, SUB), SUB)
    n_steps = pl.cdiv(b_align, MAX_TILE)
    if b_align >= 512:                 # worth splitting across the 2 TCs on v7x
        n_steps = max(n_steps, 2)
        n_steps += n_steps % 2         # even step count keeps both TCs busy
    bt = _round_up(pl.cdiv(b_align, n_steps), SUB)
    bp = _round_up(b_align, bt)
    return bt, bp


# ----------------------------------------------------------------------------
# kernels
# ----------------------------------------------------------------------------
def _fused_mlp(ob, slab_ref, meta):
    """bf16 MXU operands, f32 accumulation. Returns f32 [rows, 128]."""
    ob_dim = meta["ob_dim"]
    r_w1, r_b1, r_w2, r_b2 = meta["r_w1"], meta["r_b1"], meta["r_w2"], meta["r_b2"]
    w1 = slab_ref[r_w1:r_w1 + ob_dim, :]               # [OB, 128] bf16
    b1 = slab_ref[r_b1:r_b1 + 1, :]                    # [1, 128]  bf16
    w2 = slab_ref[r_w2:r_w2 + LANES, :]                # [128, 128] bf16 block-diag
    b2 = slab_ref[r_b2:r_b2 + 1, :]                    # [1, 128]  bf16
    h = jnp.tanh(jnp.dot(ob, w1, preferred_element_type=jnp.float32) + b1)   # f32
    return jnp.dot(h.astype(jnp.bfloat16), w2,
                   preferred_element_type=jnp.float32) + b2                  # f32


def _make_fwd_kernel(meta):
    def kernel(ob_ref, slab_ref, out_ref):
        fused = _fused_mlp(ob_ref[...], slab_ref, meta)    # [bt, 128] f32
        out_ref[...] = fused.astype(jnp.bfloat16)          # lane-dense bf16 writeback
    return kernel


def _make_action_kernel(meta):
    n_actions = meta["n_actions"]

    def kernel(ob_ref, g_ref, slab_ref, out_ref):
        fused = _fused_mlp(ob_ref[...], slab_ref, meta)    # [1, 128] f32 (logits kept f32)

        # Gumbel-max categorical sample over lanes 0..A-1 (noise precomputed on host;
        # pltpu.prng_* is avoided so the kernel also runs under interpret mode).
        g = g_ref[...]                                     # [1, 128] f32 Gumbel(0,1)
        lane = jax.lax.broadcasted_iota(jnp.int32, (1, LANES), 1)
        scores = jnp.where(lane < n_actions, fused + g, jnp.float32(-1e30))
        m = jnp.max(scores, axis=-1, keepdims=True)        # [1, 1]
        act = jnp.min(jnp.where(scores >= m, lane, jnp.int32(LANES)),
                      axis=-1, keepdims=True)              # [1, 1] argmax (low-index ties)
        val = jnp.sum(jnp.where(lane == n_actions, fused, jnp.float32(0.0)),
                      axis=-1, keepdims=True)              # [1, 1] critic value

        # One unmasked lane-dense store: lane 0 = action (as f32), lane 1 = value.
        out_ref[...] = (jnp.where(lane == 0, act.astype(jnp.float32), jnp.float32(0.0))
                        + jnp.where(lane == 1, val, jnp.float32(0.0)))

    return kernel


# ----------------------------------------------------------------------------
# wrappers
# ----------------------------------------------------------------------------
def build_forward(meta):
    """Batched actor+critic forward.

    Returns jitted (ob[B,OB] f32, slab) -> packed bf16 [B, 128] block:
    lanes [0, A) = actor logits, lane A = critic value.  Downstream consumers
    (losses, sampling) should index lanes directly instead of materializing
    separate compacted logits/value arrays (saves a full output HBM round trip).
    """
    kernel = _make_fwd_kernel(meta)
    ob_dim, rows = meta["ob_dim"], meta["rows"]

    @jax.jit
    def forward(ob, packed):
        B = ob.shape[0]
        bt, bp = _batch_tiling(B)
        obp = ob.astype(jnp.bfloat16)            # bf16 input: halves ob DMA
        if bp != B:
            obp = jnp.pad(obp, ((0, bp - B), (0, 0)))
        out = pl.pallas_call(
            kernel,
            out_shape=jax.ShapeDtypeStruct((bp, LANES), jnp.bfloat16),
            grid_spec=pltpu.PrefetchScalarGridSpec(
                num_scalar_prefetch=0,
                grid=(bp // bt,),
                in_specs=[pl.BlockSpec((bt, ob_dim), lambda i: (i, 0)),
                          # constant (0,0) index_map: Pallas keeps the slab resident,
                          # no per-step re-DMA
                          pl.BlockSpec((rows, LANES), lambda i: (0, 0))],
                out_specs=pl.BlockSpec((bt, LANES), lambda i: (i, 0))),
            # Batch axis is embarrassingly parallel (v7x: split across both TCs).
            # Working set at bt=2048: ob 64 KiB + out 512 KiB + slab 44 KiB,
            # double-buffered ~1.2 MiB -- far under the scoped VMEM default.
            compiler_params=pltpu.CompilerParams(
                dimension_semantics=("parallel",)),
        )(obp, packed)
        return out[:B] if bp != B else out

    return forward


def build_get_action(meta):
    """Single-observation fused forward + Gumbel-max sample + value.

    Returns jitted (ob[OB] f32, slab, key) -> (act () int32, val () f32).
    Caller must pass a fresh PRNG key per env step.
    """
    kernel = _make_action_kernel(meta)
    ob_dim = meta["ob_dim"]
    vmem = pl.BlockSpec(memory_space=pltpu.MemorySpace.VMEM)

    @jax.jit
    def get_action(ob, packed, key):
        ob1 = ob.astype(jnp.bfloat16).reshape(1, ob_dim)   # no 8-row host broadcast
        g = jax.random.gumbel(key, (1, LANES), jnp.float32)
        res = pl.pallas_call(
            kernel,
            out_shape=jax.ShapeDtypeStruct((1, LANES), jnp.float32),
            in_specs=[vmem, vmem, vmem],
            out_specs=vmem,
        )(ob1, g, packed)
        return res[0, 0].astype(jnp.int32), res[0, 1]

    return get_action


def init_params(key, ob_dim, hidden, n_actions):
    ks = jax.random.split(key, 4)
    scale = 0.1
    return {
        "w1a": scale * jax.random.normal(ks[0], (ob_dim, hidden), jnp.float32),
        "b1a": jnp.zeros((1, hidden), jnp.float32),
        "w2a": scale * jax.random.normal(ks[1], (hidden, n_actions), jnp.float32),
        "b2a": jnp.zeros((1, n_actions), jnp.float32),
        "w1c": scale * jax.random.normal(ks[2], (ob_dim, hidden), jnp.float32),
        "b1c": jnp.zeros((1, hidden), jnp.float32),
        "w2c": scale * jax.random.normal(ks[3], (hidden, 1), jnp.float32),
        "b2c": jnp.zeros((1, 1), jnp.float32),
    }


if __name__ == "__main__":
    OB_DIM, HIDDEN, N_ACTIONS, BATCH = 16, 32, 8, 8

    root = jax.random.PRNGKey(0)
    k_params, k_ob, k_sample = jax.random.split(root, 3)

    params = init_params(k_params, OB_DIM, HIDDEN, N_ACTIONS)
    packed, meta = pack_params(params)
    ob = jax.random.normal(k_ob, (BATCH, OB_DIM), jnp.float32)

    # ---- batched forward (rollout-style evaluation) ----
    forward = build_forward(meta)
    out = forward(ob, packed)
    jax.block_until_ready(out)
    # consumer-side lane indexing (only done here for the correctness check)
    logits = out[:, :N_ACTIONS].astype(jnp.float32)
    vals = out[:, N_ACTIONS:N_ACTIONS + 1].astype(jnp.float32)

    # reference (un-packed, full-precision f32) forward for correctness
    hp = jax.lax.Precision.HIGHEST
    ref_logits = jnp.dot(jnp.tanh(jnp.dot(ob, params["w1a"], precision=hp) + params["b1a"]),
                         params["w2a"], precision=hp) + params["b2a"]
    ref_vals = jnp.dot(jnp.tanh(jnp.dot(ob, params["w1c"], precision=hp) + params["b1c"]),
                       params["w2c"], precision=hp) + params["b2c"]

    assert logits.shape == (BATCH, N_ACTIONS)
    assert vals.shape == (BATCH, 1)
    # bf16 operands + bf16 output -> loosened tolerance vs. the f32 reference
    assert jnp.allclose(logits, ref_logits, atol=3e-2, rtol=3e-2)
    assert jnp.allclose(vals, ref_vals, atol=3e-2, rtol=3e-2)

    # ---- single-observation get_action (fused sampling) ----
    get_action = build_get_action(meta)
    act, val = get_action(ob[0], packed, k_sample)
    jax.block_until_ready((act, val))

    assert act.shape == () and val.shape == ()
    assert 0 <= int(act) < N_ACTIONS
    assert abs(float(val) - float(ref_vals[0, 0])) < 3e-2

    print("KERNEL_OK")
</pallas_src>

<mosaic_0001>
module attributes {stable_mosaic.version = 11 : i64} {
  func.func @kernel(%arg0: i32, %arg1: memref<16x16xbf16, #tpu.memory_space<vmem>>, %arg2: memref<176x128xbf16, #tpu.memory_space<vmem>>, %arg3: memref<16x128xbf16, #tpu.memory_space<vmem>>) attributes {dimension_semantics = [#tpu.dimension_semantics<parallel>], iteration_bounds = array<i64: 1>, scalar_prefetch = 0 : i64, scratch_operands = 0 : i64, tpu.core_type = #tpu.core_type<tc>, window_params = [{transform_indices = @transform_0, window_bounds = array<i64: 16, 16>}, {pipeline_mode = #tpu.pipeline_mode<synchronous>, transform_indices = @transform_1, window_bounds = array<i64: 176, 128>}, {transform_indices = @transform_2, window_bounds = array<i64: 16, 128>}]} {
    %c0 = arith.constant 0 : index
    %c0_0 = arith.constant 0 : index
    %0 = vector.load %arg1[%c0, %c0_0] : memref<16x16xbf16, #tpu.memory_space<vmem>>, vector<16x16xbf16>
    %c0_1 = arith.constant 0 : index
    %c0_2 = arith.constant 0 : index
    %1 = vector.load %arg2[%c0_1, %c0_2] : memref<176x128xbf16, #tpu.memory_space<vmem>>, vector<16x128xbf16>
    %c16 = arith.constant 16 : index
    %c0_3 = arith.constant 0 : index
    %2 = vector.load %arg2[%c16, %c0_3] : memref<176x128xbf16, #tpu.memory_space<vmem>>, vector<1x128xbf16>
    %c32 = arith.constant 32 : index
    %c0_4 = arith.constant 0 : index
    %3 = vector.load %arg2[%c32, %c0_4] : memref<176x128xbf16, #tpu.memory_space<vmem>>, vector<128x128xbf16>
    %c160 = arith.constant 160 : index
    %c0_5 = arith.constant 0 : index
    %4 = vector.load %arg2[%c160, %c0_5] : memref<176x128xbf16, #tpu.memory_space<vmem>>, vector<1x128xbf16>
    %cst = arith.constant dense<0.000000e+00> : vector<16x128xf32>
    %5 = tpu.matmul %0, %1, %cst {dimension_numbers = #tpu.dot_dimension_numbers<[1], [0], [0], [1], [0, 0, 1, 1], [], []>} : vector<16x16xbf16>, vector<16x128xbf16>, vector<16x128xf32> -> vector<16x128xf32>
    %6 = arith.extf %2 : vector<1x128xbf16> to vector<1x128xf32>
    %7 = vector.broadcast %6 : vector<1x128xf32> to vector<16x128xf32>
    %8 = arith.addf %5, %7 : vector<16x128xf32>
    %9 = math.tanh %8 : vector<16x128xf32>
    %10 = arith.truncf %9 : vector<16x128xf32> to vector<16x128xbf16>
    %cst_6 = arith.constant dense<0.000000e+00> : vector<16x128xf32>
    %11 = tpu.matmul %10, %3, %cst_6 {dimension_numbers = #tpu.dot_dimension_numbers<[1], [0], [0], [1], [0, 0, 1, 1], [], []>} : vector<16x128xbf16>, vector<128x128xbf16>, vector<16x128xf32> -> vector<16x128xf32>
    %12 = arith.extf %4 : vector<1x128xbf16> to vector<1x128xf32>
    %13 = vector.broadcast %12 : vector<1x128xf32> to vector<16x128xf32>
    %14 = arith.addf %11, %13 : vector<16x128xf32>
    %15 = arith.truncf %14 : vector<16x128xf32> to vector<16x128xbf16>
    %c0_7 = arith.constant 0 : index
    %c0_8 = arith.constant 0 : index
    %16 = vector.load %arg3[%c0_7, %c0_8] : memref<16x128xbf16, #tpu.memory_space<vmem>>, vector<16x128xbf16>
    tpu.vector_store %arg3[%c0_7, %c0_8], %15 {strides = array<i32>} : memref<16x128xbf16, #tpu.memory_space<vmem>>, vector<16x128xbf16>,
    return
  }
  func.func @transform_0(%arg0: i32) -> (i32, i32) {
    %c0_i32 = arith.constant 0 : i32
    %c0_i32_0 = arith.constant 0 : i32
    return %arg0, %c0_i32 : i32, i32
  }
  func.func @transform_1(%arg0: i32) -> (i32, i32) {
    %c0_i32 = arith.constant 0 : i32
    %c0_i32_0 = arith.constant 0 : i32
    %c0_i32_1 = arith.constant 0 : i32
    return %c0_i32, %c0_i32_0 : i32, i32
  }
  func.func @transform_2(%arg0: i32) -> (i32, i32) {
    %c0_i32 = arith.constant 0 : i32
    %c0_i32_0 = arith.constant 0 : i32
    return %arg0, %c0_i32 : i32, i32
  }
}

</mosaic_0001>

<bundles_post_ra>
// kernel: forward.1
= control target key start
LH: loop header
LB: loop body
LE: loop exit
PB: predicated region body
PF: predicated region fallthrough
CT: control target
= control target key end

     0   :  { %7 = vsyncpa [#allocation3], 0  ;;  %s319_s9 = smov [#allocation2]   ;;  %s348_s0 = inlined_call_operand.vmem [shape: bf16[16,16], index: 0, kind: input, shape index: {}]   ;;  %s349_s1 = inlined_call_operand.hbm [shape: bf16[176,128], index: 1, kind: input, shape index: {}]   ;;  %s350_s2 = inlined_call_operand.vmem [shape: bf16[16,128], index: 2, kind: output, shape index: {}]  }
   0x1   :  { %s15_s10 = sshll.u32 %s319_s9, 4  ;;  %s16_s10 = int_to_ptr.vmem [resolvable:$true] %s15_s10 }
   0x2   :  { %s305_s11 = scalar_lea.vmem %s16_s10, 1408  ;;  %p310_p1 = scmp.lt.s32.totalorder %s16_s10, %s16_s10 }
   0x3   :  { %p306_p0 = scmp.ne.s32.totalorder %s16_s10, %s305_s11  ;;  %p311_p2 = scmp.lt.s32.totalorder %s305_s11, %s305_s11 }
   0x5   :  { %p312_p3 = por %p311_p2, %p310_p1 }
   0x7   :  { %p313_p4 = pnand %p312_p3, %p306_p0 }
   0x9   :  { %316 = shalt.err (!%p313_p4)
}
   0xa   :  { %s320_s12 = smov 64   ;;  %s321_s13 = smov 4  }
   0xb   :  { %21 = dma.hbm_to_vmem [thread:$0]  %s349_s1, 1408, %s16_s10, [#allocation3], %s320_s12, %s320_s12, %s321_s13  }
   0xc   :  { %317 = dma.done.wait [#allocation3], 1408  }
   0xd   :  { %318 = vsyncadd [#allocation3], 4294965888  ;;  %v322_v0 = vmov 0.0   ;;  %vm323_vm0 = vmmov 0   ;;  %v283_v1 = vld [vmem:[#allocation2] sm:$0xff]   ;;  %vm64_vm1 = vcmask 130048   ;;  %v49_v11 = vlaneseq }
   0xe   :  { %252 = vmatprep.subr.bf16.mxu0 %v322_v0  ;;  %254 = vmatprep.mubr.msk.bf16.mxu0 %vm323_vm0, %v322_v0  ;;  %v284_v2 = vld [vmem:[%s348_s0] sm:$0xff]   ;;  %v285_v3 = vld [vmem:[#allocation2 + $0x48] sm:$0xff]   ;;  %v287_v5 = vld [vmem:[#allocation2 + $0x38] sm:$0xff]  }
   0xf   :  { %258 = vmatprep.subr.bf16.mxu1 %v322_v0  ;;  %274 = vmatprep.mubr.msk.bf16.mxu1 %vm323_vm0, %v322_v0  ;;  %v286_v4 = vld [vmem:[#allocation2 + $0x40] sm:$0xff]   ;;  %v288_v6 = vld [vmem:[#allocation2 + $0x30] sm:$0xff]   ;;  %v289_v7 = vld [vmem:[#allocation2 + $0x28] sm:$0xff]   ;;  %v50_v12 = vshrl.u32 %v49_v11, 7 }
  0x10   :  { %253 = vmatpush3.bf16.msra.mxu0 %v283_v1  ;;  %259 = vmatpush3.bf16.msra.mxu1 %v285_v3  ;;  %v290_v8 = vld [vmem:[#allocation2 + $0x20] sm:$0xff]   ;;  %v291_v9 = vld [vmem:[#allocation2 + $0x18] sm:$0xff]   ;;  %v292_v10 = vld [vmem:[#allocation2 + $0x10] sm:$0xff]  }
  0x11   :  { %260 = vmatprep.subr.bf16.mxu1 %v322_v0  ;;  %v30_v13 = vld [vmem:[#allocation2 + $0x8] sm:$0x1]  ;;  %v51_v15 = vsub.s32 0, %v50_v12  ;;  %v47_v26 = vld [vmem:[#allocation2 + $0x50] sm:$0x1] }
  0x12   :  { %v48_v14 = vunpack.c.l.bf16 %v30_v13  ;;  %v112_v27 = vunpack.c.l.bf16 %v47_v26 }
  0x13   :  { %255 = vmatmul.mubr.msk.bf16.vlgmr.msra.gmra.mxu0 %vm64_vm1, %v284_v2 }
  0x14   :  { %261 = vmatpush3.bf16.msra.mxu1 %v286_v4  ;;  %v52_v16 = vrot.slane %v48_v14, %v51_v15  ;;  %v116_v29 = vrot.slane %v112_v27, %v51_v15 }
  0x15   :  { %262 = vmatprep.subr.bf16.mxu1 %v322_v0 }
  0x18   :  { %263 = vmatpush3.bf16.msra.mxu1 %v287_v5 }
  0x19   :  { %264 = vmatprep.subr.bf16.mxu1 %v322_v0 }
  0x1c   :  { %265 = vmatpush3.bf16.msra.mxu1 %v288_v6 }
  0x1d   :  { %266 = vmatprep.subr.bf16.mxu1 %v322_v0 }
  0x20   :  { %267 = vmatpush3.bf16.msra.mxu1 %v289_v7 }
  0x21   :  { %268 = vmatprep.subr.bf16.mxu1 %v322_v0 }
  0x24   :  { %269 = vmatpush3.bf16.msra.mxu1 %v290_v8 }
  0x25   :  { %270 = vmatprep.subr.bf16.mxu1 %v322_v0 }
  0x28   :  { %271 = vmatpush3.bf16.msra.mxu1 %v291_v9 }
  0x29   :  { %272 = vmatprep.subr.bf16.mxu1 %v322_v0 }
  0x2c   :  { %273 = vmatpush3.bf16.msra.mxu1 %v292_v10 }
  0xd3   :  { %v102_v17 = vpop.f32.mrf.mxu0 }
  0xd4   :  { %v103_v18 = vadd.f32 %v102_v17, %v52_v16 }
  0xd5   :  { %v256_v19 = vpop.f32.mrf.mxu0 }
  0xd6   :  { %293 = vtanh.f32 %v103_v18 }
  0xd7   :  { %v105_v20 = vpop.f32.mrf.mxu0 }
  0xd8   :  { %v106_v21 = vadd.f32 %v105_v20, %v52_v16 }
  0xd9   :  { %v257_v22 = vpop.f32.mrf.mxu0 }
  0xda   :  { %295 = vtanh.f32 %v106_v21 }
  0xe3   :  { %v294_v23 = vpop.eup %293 }
  0xe7   :  { %v296_v24 = vpop.eup %295 }
  0xe8   :  { %v111_v25 = vpack.c.bf16 %v296_v24, %v294_v23 }
  0xea   :  { %275 = vmatmul.mubr.bf16.vlgmr.msra.gmra.mxu1 %v111_v25 }
 0x1aa   :  { %v199_v28 = vpop.f32.mrf.mxu1 }
 0x1ab   :  { %v200_v32 = vadd.f32 %v199_v28, %v116_v29 }
 0x1ac   :  { %v276_v30 = vpop.f32.mrf.mxu1 }
 0x1ae   :  { %v202_v31 = vpop.f32.mrf.mxu1 }
 0x1af   :  { %v203_v33 = vadd.f32 %v202_v31, %v116_v29 }
 0x1b0   :  { %v277_v34 = vpop.f32.mrf.mxu1 }
 0x1b1   :  { %v239_v35 = vpack.c.bf16 %v203_v33, %v200_v32 }
 0x1b3   :  { %240 = vst [vmem:[%s350_s2] sm:$0xff] %v239_v35  }
 0x1b4   :  { %220 = vsyncpa [#allocation3], 1 }

</bundles_post_ra>
